<compile_context>
chip_gen: v5e
topology: v5e:2x2
jax: 0.10.0
libtpu: 0.0.40
codegen_flags: <defaults>
</compile_context>

<pallas_src>
import functools

import jax
import jax.numpy as jnp
import numpy as np
from jax import lax
from jax.experimental import pallas as pl
from jax.experimental.pallas import tpu as pltpu

EPS = 1e-5          # nn.InstanceNorm2d default eps
NEG_SLOPE = 0.2     # LeakyReLU slope
K = 4               # conv kernel size
PAD = 1             # conv padding (reflect)


def _round_up(x, m):
    return (x + m - 1) // m * m


def _block_kernel(p_ref, w_ref, o_ref, sum_ref, sq_ref, *, tp, n_pt, inv_p):
    """One (batch i, C_out-tile c, P-tile k) grid step.

    p_ref   : (1, tp, kkc_p)      bf16 im2col patch rows for this P-tile
    w_ref   : (kkc_p, tile_c)     bf16 flattened conv-weight slab for this C-tile
    o_ref   : (1, p_pad, tile_c)  bf16 per-(image, C-tile) output, VMEM-resident across k
    sum_ref, sq_ref : (1, tile_c) f32 partial-statistics scratch
    """
    k = pl.program_id(2)

    @pl.when(k == 0)
    def _init():
        sum_ref[...] = jnp.zeros_like(sum_ref)
        sq_ref[...] = jnp.zeros_like(sq_ref)

    # conv tile = im2col GEMM on the MXU (bf16 operands, f32 accumulate).
    # No bias add: a per-channel constant is cancelled exactly by the instance norm.
    y = jnp.dot(p_ref[0], w_ref[...], preferred_element_type=jnp.float32)

    # One-pass partial statistics, taken from the f32 y BEFORE the bf16 staging cast.
    # Zero-padded patch rows / weight columns give y == 0 exactly (no bias), so padding
    # contributes nothing to either sum.
    sum_ref[...] += jnp.sum(y, axis=0, keepdims=True)
    sq_ref[...] += jnp.sum(y * y, axis=0, keepdims=True)

    row0 = pl.multiple_of(k * tp, tp)
    o_ref[0, pl.ds(row0, tp), :] = y.astype(o_ref.dtype)   # bf16 stash (halves residency)

    @pl.when(k == n_pt - 1)
    def _finalize():
        mean = sum_ref[...] * inv_p                         # divide by the true P
        # Clamp guards against f32 cancellation in E[y^2] - mean^2 (can dip below 0).
        var = jnp.maximum(sq_ref[...] * inv_p - mean * mean, 0.0)
        inv_std = lax.rsqrt(var + EPS)
        # n_pt is compile-time static -> fully unrolled normalize + LeakyReLU sweep.
        for t in range(n_pt):
            r0 = pl.multiple_of(t * tp, tp)
            z = (o_ref[0, pl.ds(r0, tp), :].astype(jnp.float32) - mean) * inv_std
            o_ref[0, pl.ds(r0, tp), :] = jnp.where(
                z > 0, z, NEG_SLOPE * z).astype(o_ref.dtype)


def _im2col_reflect(x_nhwc, stride, kkc_pad):
    """Reflect-pad by 1 and unfold 4x4 patches.

    Returns (N, P, kkc_pad), (kh, kw, c)-ordered. The contraction-dim zero padding is
    folded into the single concatenation (no second full-size pad copy for the K dim).
    """
    xp = jnp.pad(x_nhwc, ((0, 0), (PAD, PAD), (PAD, PAD), (0, 0)), mode="reflect")
    n, hp, wp, c = xp.shape
    h_out = (hp - K) // stride + 1
    w_out = (wp - K) // stride + 1
    cols = []
    for kh in range(K):
        for kw in range(K):
            cols.append(xp[:, kh:kh + stride * h_out:stride,
                           kw:kw + stride * w_out:stride, :])   # (N, H_out, W_out, C)
    kkc = K * K * c
    if kkc_pad > kkc:
        cols.append(jnp.zeros((n, h_out, w_out, kkc_pad - kkc), x_nhwc.dtype))
    patches = jnp.concatenate(cols, axis=-1)                    # (N, H_out, W_out, kkc_pad)
    return patches.reshape(n, h_out * w_out, kkc_pad), h_out, w_out


def _weight_spec(kkc_p, tile_c, n_ct):
    """Weight BlockSpec. Single-buffer it when its index map is constant (n_ct == 1):
    the second pipeline buffer would never be used for prefetch, so dropping it saves
    kkc_p * tile_c * 2 bytes of VMEM for free."""
    idx = lambda i, c, k: (0, c)
    if n_ct == 1:
        try:
            return pl.BlockSpec((kkc_p, tile_c), idx, pipeline_mode=pl.Buffered(1)), 1
        except Exception:   # older jax without pipeline_mode / Buffered
            pass
    return pl.BlockSpec((kkc_p, tile_c), idx), 2


def _vmem_limit_bytes(tp, kkc_p, tile_c, p_pad, w_bufs):
    """Size the scoped-VMEM request from the actual buffers + headroom, capped below
    the physical capacity (64 MiB/core on v7x, 128 MiB on v5e/v6e)."""
    bpe = 2  # bf16
    needed = (2 * tp * kkc_p * bpe           # streamed patch tile, double-buffered
              + w_bufs * kkc_p * tile_c * bpe
              + 2 * p_pad * tile_c * bpe     # resident output stage (2 bufs across (i,c))
              + 2 * tile_c * 4               # stats scratch
              + (1 << 20))                   # slack for compiler temporaries
    try:
        phys = pltpu.get_tpu_info().vmem_capacity_bytes
    except Exception:
        phys = 128 * 1024 * 1024
    limit = min(needed + 16 * 1024 * 1024, phys - 8 * 1024 * 1024)
    return int(max(limit, 32 * 1024 * 1024))


def block_forward(x, weight, bias, stride, *, tile_rows=512, tile_cols=256,
                  channels_last=False):
    """Forward pass of `Block`.

    x       : (N, C_in, H, W) if channels_last=False (PyTorch layout), else (N, H, W, C_in)
    weight  : (C_out, C_in, 4, 4)
    bias    : (C_out,) -- accepted for API parity; mathematically a no-op here because
              InstanceNorm2d(affine=False) subtracts the per-channel mean. Only valid
              while the norm immediately follows the conv.
    returns : (N, H_out, W_out, C_out) bfloat16, channels-last (convert to NCHW only at
              the network boundary; a following Block consumes bf16 NHWC directly).
    """
    del bias  # cancelled exactly by the instance norm
    x_nhwc = x if channels_last else jnp.transpose(x, (0, 2, 3, 1))
    x_nhwc = x_nhwc.astype(jnp.bfloat16)                 # bf16 MXU operand, halves HBM
    n = x_nhwc.shape[0]
    c_in = x_nhwc.shape[-1]
    c_out = weight.shape[0]

    kkc = K * K * c_in
    kkc_p = _round_up(kkc, 128)              # unmasked vld / full MXU K-dim
    c_out_p = _round_up(c_out, 128)          # lane-dense output stores
    tile_c = min(_round_up(tile_cols, 128), c_out_p)
    n_ct = c_out_p // tile_c                 # C_out tiles: bound VMEM residency, feed
                                             # v7x's two TensorCores even at N=1

    patches, h_out, w_out = _im2col_reflect(x_nhwc, stride, kkc_p)   # (N, P, kkc_p) bf16
    p = h_out * w_out

    tp = _round_up(min(tile_rows, p), 16)    # bf16 sublane packing: multiple of 16
    p_pad = _round_up(p, tp)
    n_pt = p_pad // tp
    if p_pad > p:
        # Ragged last P-tile: zero rows give y == 0 (no bias) -> stats stay exact
        # (we divide by the true P). This pad is a no-op whenever tp divides P.
        patches = jnp.pad(patches, ((0, 0), (0, p_pad - p), (0, 0)))

    # (C_out, C_in, K, K) -> (K, K, C_in, C_out) -> (kkc, C_out), zero-padded, bf16.
    w_mat = jnp.transpose(weight, (2, 3, 1, 0)).reshape(kkc, c_out)
    w_mat = jnp.pad(w_mat, ((0, kkc_p - kkc), (0, c_out_p - c_out))).astype(jnp.bfloat16)

    w_spec, w_bufs = _weight_spec(kkc_p, tile_c, n_ct)
    kernel = functools.partial(_block_kernel, tp=tp, n_pt=n_pt, inv_p=1.0 / p)
    out = pl.pallas_call(
        kernel,
        out_shape=jax.ShapeDtypeStruct((n, p_pad, c_out_p), jnp.bfloat16),
        grid_spec=pltpu.PrefetchScalarGridSpec(
            num_scalar_prefetch=0,
            grid=(n, n_ct, n_pt),                   # reduction (P-tile) axis last
            in_specs=[
                pl.BlockSpec((1, tp, kkc_p), lambda i, c, k: (i, k, 0)),  # streamed patches
                w_spec,                                                   # weight slab
            ],
            out_specs=pl.BlockSpec((1, p_pad, tile_c), lambda i, c, k: (i, 0, c)),
            scratch_shapes=[
                pltpu.VMEM((1, tile_c), jnp.float32),   # partial sum(y)
                pltpu.VMEM((1, tile_c), jnp.float32),   # partial sum(y*y)
            ],
        ),
        compiler_params=pltpu.CompilerParams(
            dimension_semantics=("parallel", "parallel", "arbitrary"),
            vmem_limit_bytes=_vmem_limit_bytes(tp, kkc_p, tile_c, p_pad, w_bufs),
        ),
    )(patches, w_mat)

    # Strip padding, stay channels-last / bf16 between Blocks. Padded output channels
    # come out exactly zero (mean 0, var 0 -> z = 0), so keeping C_out padded across
    # layers would be numerically inert; padded P rows must always be stripped.
    return out[:, :p, :c_out].reshape(n, h_out, w_out, c_out)


def _reference(x_nchw, weight, bias, stride):
    """Pure-JAX f32 reference mirroring the PyTorch module (bias included)."""
    xp = jnp.pad(x_nchw, ((0, 0), (0, 0), (PAD, PAD), (PAD, PAD)), mode="reflect")
    y = lax.conv_general_dilated(
        xp, weight, window_strides=(stride, stride), padding="VALID",
        dimension_numbers=("NCHW", "OIHW", "NCHW"),
    ) + bias[None, :, None, None]
    mean = jnp.mean(y, axis=(2, 3), keepdims=True)
    var = jnp.mean((y - mean) ** 2, axis=(2, 3), keepdims=True)
    y = (y - mean) * lax.rsqrt(var + EPS)
    return jnp.where(y > 0, y, NEG_SLOPE * y)


def _run_case(n, c_in, c_out, h, w, stride, tile_rows, tile_cols, key):
    kx, kw_, kb = jax.random.split(key, 3)
    x = jax.random.normal(kx, (n, c_in, h, w), dtype=jnp.float32)
    fan_in = c_in * K * K
    bound = 1.0 / np.sqrt(fan_in)
    weight = jax.random.uniform(kw_, (c_out, c_in, K, K), jnp.float32, -bound, bound)
    bias = jax.random.uniform(kb, (c_out,), jnp.float32, -bound, bound)

    out_nhwc = jax.block_until_ready(
        block_forward(x, weight, bias, stride, tile_rows=tile_rows, tile_cols=tile_cols))
    ref_nhwc = jax.block_until_ready(
        jnp.transpose(_reference(x, weight, bias, stride), (0, 2, 3, 1)))

    # bf16 operands + bf16 staging/output -> compare against the f32 (bias-included)
    # reference at ~3e-2.
    np.testing.assert_allclose(np.asarray(out_nhwc.astype(jnp.float32)),
                               np.asarray(ref_nhwc), rtol=3e-2, atol=3e-2)

    h_out = (h + 2 * PAD - K) // stride + 1
    w_out = (w + 2 * PAD - K) // stride + 1
    assert out_nhwc.shape == (n, h_out, w_out, c_out)
    return out_nhwc


if __name__ == "__main__":
    # Primary case (batch=2, C_in=4, C_out=8, 16x16, stride 2):
    # tile_rows=32 -> 2 P-tiles, 1 C-tile; exercises the pipelined partial-stats path.
    out = _run_case(2, 4, 8, 16, 16, 2, tile_rows=32, tile_cols=256,
                    key=jax.random.PRNGKey(0))
    # PyTorch NCHW layout is one transpose away, done only at the network boundary:
    assert jnp.transpose(out, (0, 3, 1, 2)).shape[1] == 8

    # Secondary case: stride 1, C_out=192 (c_out_p=256) with tile_cols=128 -> 2 C-out
    # tiles and a ragged P (225 -> padded to 256), exercising the C-tiling grid axis
    # and the P-padding path.
    _run_case(2, 4, 192, 16, 16, 1, tile_rows=64, tile_cols=128,
              key=jax.random.PRNGKey(1))

    print("KERNEL_OK")
</pallas_src>

<mosaic_0001>
module attributes {stable_mosaic.version = 11 : i64} {
  func.func @_block_kernel(%arg0: i32, %arg1: i32, %arg2: i32, %arg3: memref<1x32x128xbf16, #tpu.memory_space<vmem>>, %arg4: memref<128x128xbf16, #tpu.memory_space<vmem>>, %arg5: memref<1x64x128xbf16, #tpu.memory_space<vmem>>, %arg6: memref<1x128xf32, #tpu.memory_space<vmem>>, %arg7: memref<1x128xf32, #tpu.memory_space<vmem>>) attributes {dimension_semantics = [#tpu.dimension_semantics<parallel>, #tpu.dimension_semantics<parallel>, #tpu.dimension_semantics<arbitrary>], iteration_bounds = array<i64: 2, 1, 2>, scalar_prefetch = 0 : i64, scratch_operands = 2 : i64, tpu.core_type = #tpu.core_type<tc>, window_params = [{transform_indices = @transform_0, window_bounds = array<i64: 1, 32, 128>}, {pipeline_mode = #tpu.pipeline_mode<synchronous>, transform_indices = @transform_1, window_bounds = array<i64: 128, 128>}, {transform_indices = @transform_2, window_bounds = array<i64: 1, 64, 128>}]} {
    %c0_i32 = arith.constant 0 : i32
    %0 = arith.cmpi eq, %arg2, %c0_i32 : i32
    %1 = arith.extui %0 : i1 to i32
    %c0_i32_0 = arith.constant 0 : i32
    %2 = arith.cmpi ne, %1, %c0_i32_0 : i32
    scf.if %2 {
      %cst_18 = arith.constant 0.000000e+00 : f32
      %28 = vector.broadcast %cst_18 : f32 to vector<1x128xf32>
      %c0_19 = arith.constant 0 : index
      %c0_20 = arith.constant 0 : index
      %29 = vector.load %arg6[%c0_19, %c0_20] : memref<1x128xf32, #tpu.memory_space<vmem>>, vector<1x128xf32>
      tpu.vector_store %arg6[%c0_19, %c0_20], %28 {strides = array<i32>} : memref<1x128xf32, #tpu.memory_space<vmem>>, vector<1x128xf32>,
      %cst_21 = arith.constant 0.000000e+00 : f32
      %30 = vector.broadcast %cst_21 : f32 to vector<1x128xf32>
      %c0_22 = arith.constant 0 : index
      %c0_23 = arith.constant 0 : index
      %31 = vector.load %arg7[%c0_22, %c0_23] : memref<1x128xf32, #tpu.memory_space<vmem>>, vector<1x128xf32>
      tpu.vector_store %arg7[%c0_22, %c0_23], %30 {strides = array<i32>} : memref<1x128xf32, #tpu.memory_space<vmem>>, vector<1x128xf32>,
    } else {
    }
    %c0 = arith.constant 0 : index
    %c0_1 = arith.constant 0 : index
    %c0_2 = arith.constant 0 : index
    %3 = vector.load %arg3[%c0, %c0_1, %c0_2] : memref<1x32x128xbf16, #tpu.memory_space<vmem>>, vector<1x32x128xbf16>
    %4 = vector.shape_cast %3 : vector<1x32x128xbf16> to vector<32x128xbf16>
    %c0_3 = arith.constant 0 : index
    %c0_4 = arith.constant 0 : index
    %5 = vector.load %arg4[%c0_3, %c0_4] : memref<128x128xbf16, #tpu.memory_space<vmem>>, vector<128x128xbf16>
    %cst = arith.constant dense<0.000000e+00> : vector<32x128xf32>
    %6 = tpu.matmul %4, %5, %cst {dimension_numbers = #tpu.dot_dimension_numbers<[1], [0], [0], [1], [0, 0, 1, 1], [], []>} : vector<32x128xbf16>, vector<128x128xbf16>, vector<32x128xf32> -> vector<32x128xf32>
    %c0_5 = arith.constant 0 : index
    %c0_6 = arith.constant 0 : index
    %7 = vector.load %arg6[%c0_5, %c0_6] : memref<1x128xf32, #tpu.memory_space<vmem>>, vector<1x128xf32>
    %cst_7 = arith.constant dense<0.000000e+00> : vector<128xf32>
    %8 = vector.multi_reduction <add>, %6, %cst_7 [0] : vector<32x128xf32> to vector<128xf32>
    %9 = vector.shape_cast %8 : vector<128xf32> to vector<1x128xf32>
    %10 = arith.addf %7, %9 : vector<1x128xf32>
    %c0_8 = arith.constant 0 : index
    %c0_9 = arith.constant 0 : index
    %11 = vector.load %arg6[%c0_8, %c0_9] : memref<1x128xf32, #tpu.memory_space<vmem>>, vector<1x128xf32>
    tpu.vector_store %arg6[%c0_8, %c0_9], %10 {strides = array<i32>} : memref<1x128xf32, #tpu.memory_space<vmem>>, vector<1x128xf32>,
    %c0_10 = arith.constant 0 : index
    %c0_11 = arith.constant 0 : index
    %12 = vector.load %arg7[%c0_10, %c0_11] : memref<1x128xf32, #tpu.memory_space<vmem>>, vector<1x128xf32>
    %13 = arith.mulf %6, %6 : vector<32x128xf32>
    %cst_12 = arith.constant dense<0.000000e+00> : vector<128xf32>
    %14 = vector.multi_reduction <add>, %13, %cst_12 [0] : vector<32x128xf32> to vector<128xf32>
    %15 = vector.shape_cast %14 : vector<128xf32> to vector<1x128xf32>
    %16 = arith.addf %12, %15 : vector<1x128xf32>
    %c0_13 = arith.constant 0 : index
    %c0_14 = arith.constant 0 : index
    %17 = vector.load %arg7[%c0_13, %c0_14] : memref<1x128xf32, #tpu.memory_space<vmem>>, vector<1x128xf32>
    tpu.vector_store %arg7[%c0_13, %c0_14], %16 {strides = array<i32>} : memref<1x128xf32, #tpu.memory_space<vmem>>, vector<1x128xf32>,
    %c32_i32 = arith.constant 32 : i32
    %18 = arith.muli %arg2, %c32_i32 : i32
    %19 = tpu.assume_multiple %18, 32 : i32
    %20 = arith.truncf %6 : vector<32x128xf32> to vector<32x128xbf16>
    %c0_15 = arith.constant 0 : index
    %21 = arith.index_cast %19 : i32 to index
    %c0_16 = arith.constant 0 : index
    %22 = vector.load %arg5[%c0_15, %21, %c0_16] : memref<1x64x128xbf16, #tpu.memory_space<vmem>>, vector<1x32x128xbf16>
    %23 = vector.shape_cast %22 : vector<1x32x128xbf16> to vector<32x128xbf16>
    %24 = vector.shape_cast %20 : vector<32x128xbf16> to vector<1x32x128xbf16>
    tpu.vector_store %arg5[%c0_15, %21, %c0_16], %24 {strides = array<i32>} : memref<1x64x128xbf16, #tpu.memory_space<vmem>>, vector<1x32x128xbf16>,
    %c1_i32 = arith.constant 1 : i32
    %25 = arith.cmpi eq, %arg2, %c1_i32 : i32
    %26 = arith.extui %25 : i1 to i32
    %c0_i32_17 = arith.constant 0 : i32
    %27 = arith.cmpi ne, %26, %c0_i32_17 : i32
    scf.if %27 {
      %c0_18 = arith.constant 0 : index
      %c0_19 = arith.constant 0 : index
      %28 = vector.load %arg6[%c0_18, %c0_19] : memref<1x128xf32, #tpu.memory_space<vmem>>, vector<1x128xf32>
      %cst_20 = arith.constant 1.562500e-02 : f32
      %29 = vector.broadcast %cst_20 : f32 to vector<1x128xf32>
      %30 = arith.mulf %28, %29 : vector<1x128xf32>
      %c0_21 = arith.constant 0 : index
      %c0_22 = arith.constant 0 : index
      %31 = vector.load %arg7[%c0_21, %c0_22] : memref<1x128xf32, #tpu.memory_space<vmem>>, vector<1x128xf32>
      %cst_23 = arith.constant 1.562500e-02 : f32
      %32 = vector.broadcast %cst_23 : f32 to vector<1x128xf32>
      %33 = arith.mulf %31, %32 : vector<1x128xf32>
      %34 = arith.mulf %30, %30 : vector<1x128xf32>
      %35 = arith.subf %33, %34 : vector<1x128xf32>
      %cst_24 = arith.constant 0.000000e+00 : f32
      %36 = vector.broadcast %cst_24 : f32 to vector<1x128xf32>
      %37 = arith.maximumf %35, %36 : vector<1x128xf32>
      %cst_25 = arith.constant 9.99999974E-6 : f32
      %38 = vector.broadcast %cst_25 : f32 to vector<1x128xf32>
      %39 = arith.addf %37, %38 : vector<1x128xf32>
      %40 = math.rsqrt %39 : vector<1x128xf32>
      %c0_i32_26 = arith.constant 0 : i32
      %41 = tpu.assume_multiple %c0_i32_26, 32 : i32
      %c0_27 = arith.constant 0 : index
      %42 = arith.index_cast %41 : i32 to index
      %c0_28 = arith.constant 0 : index
      %43 = vector.load %arg5[%c0_27, %42, %c0_28] : memref<1x64x128xbf16, #tpu.memory_space<vmem>>, vector<1x32x128xbf16>
      %44 = vector.shape_cast %43 : vector<1x32x128xbf16> to vector<32x128xbf16>
      %45 = arith.extf %44 : vector<32x128xbf16> to vector<32x128xf32>
      %46 = vector.broadcast %30 : vector<1x128xf32> to vector<32x128xf32>
      %47 = arith.subf %45, %46 : vector<32x128xf32>
      %48 = vector.broadcast %40 : vector<1x128xf32> to vector<32x128xf32>
      %49 = arith.mulf %47, %48 : vector<32x128xf32>
      %cst_29 = arith.constant 0.000000e+00 : f32
      %50 = vector.broadcast %cst_29 : f32 to vector<32x128xf32>
      %51 = arith.cmpf ogt, %49, %50 : vector<32x128xf32>
      %cst_30 = arith.constant 2.000000e-01 : f32
      %52 = vector.broadcast %cst_30 : f32 to vector<32x128xf32>
      %53 = arith.mulf %52, %49 : vector<32x128xf32>
      %54 = arith.select %51, %49, %53 : vector<32x128xi1>, vector<32x128xf32>
      %55 = arith.truncf %54 : vector<32x128xf32> to vector<32x128xbf16>
      %c0_31 = arith.constant 0 : index
      %56 = arith.index_cast %41 : i32 to index
      %c0_32 = arith.constant 0 : index
      %57 = vector.load %arg5[%c0_31, %56, %c0_32] : memref<1x64x128xbf16, #tpu.memory_space<vmem>>, vector<1x32x128xbf16>
      %58 = vector.shape_cast %57 : vector<1x32x128xbf16> to vector<32x128xbf16>
      %59 = vector.shape_cast %55 : vector<32x128xbf16> to vector<1x32x128xbf16>
      tpu.vector_store %arg5[%c0_31, %56, %c0_32], %59 {strides = array<i32>} : memref<1x64x128xbf16, #tpu.memory_space<vmem>>, vector<1x32x128xbf16>,
      %c32_i32_33 = arith.constant 32 : i32
      %60 = tpu.assume_multiple %c32_i32_33, 32 : i32
      %c0_34 = arith.constant 0 : index
      %61 = arith.index_cast %60 : i32 to index
      %c0_35 = arith.constant 0 : index
      %62 = vector.load %arg5[%c0_34, %61, %c0_35] : memref<1x64x128xbf16, #tpu.memory_space<vmem>>, vector<1x32x128xbf16>
      %63 = vector.shape_cast %62 : vector<1x32x128xbf16> to vector<32x128xbf16>
      %64 = arith.extf %63 : vector<32x128xbf16> to vector<32x128xf32>
      %65 = vector.broadcast %30 : vector<1x128xf32> to vector<32x128xf32>
      %66 = arith.subf %64, %65 : vector<32x128xf32>
      %67 = vector.broadcast %40 : vector<1x128xf32> to vector<32x128xf32>
      %68 = arith.mulf %66, %67 : vector<32x128xf32>
      %cst_36 = arith.constant 0.000000e+00 : f32
      %69 = vector.broadcast %cst_36 : f32 to vector<32x128xf32>
      %70 = arith.cmpf ogt, %68, %69 : vector<32x128xf32>
      %cst_37 = arith.constant 2.000000e-01 : f32
      %71 = vector.broadcast %cst_37 : f32 to vector<32x128xf32>
      %72 = arith.mulf %71, %68 : vector<32x128xf32>
      %73 = arith.select %70, %68, %72 : vector<32x128xi1>, vector<32x128xf32>
      %74 = arith.truncf %73 : vector<32x128xf32> to vector<32x128xbf16>
      %c0_38 = arith.constant 0 : index
      %75 = arith.index_cast %60 : i32 to index
      %c0_39 = arith.constant 0 : index
      %76 = vector.load %arg5[%c0_38, %75, %c0_39] : memref<1x64x128xbf16, #tpu.memory_space<vmem>>, vector<1x32x128xbf16>
      %77 = vector.shape_cast %76 : vector<1x32x128xbf16> to vector<32x128xbf16>
      %78 = vector.shape_cast %74 : vector<32x128xbf16> to vector<1x32x128xbf16>
      tpu.vector_store %arg5[%c0_38, %75, %c0_39], %78 {strides = array<i32>} : memref<1x64x128xbf16, #tpu.memory_space<vmem>>, vector<1x32x128xbf16>,
    } else {
    }
    return
  }
  func.func @transform_0(%arg0: i32, %arg1: i32, %arg2: i32) -> (i32, i32, i32) {
    %c0_i32 = arith.constant 0 : i32
    %c0_i32_0 = arith.constant 0 : i32
    return %arg0, %arg2, %c0_i32 : i32, i32, i32
  }
  func.func @transform_1(%arg0: i32, %arg1: i32, %arg2: i32) -> (i32, i32) {
    %c0_i32 = arith.constant 0 : i32
    %c0_i32_0 = arith.constant 0 : i32
    return %c0_i32, %arg1 : i32, i32
  }
  func.func @transform_2(%arg0: i32, %arg1: i32, %arg2: i32) -> (i32, i32, i32) {
    %c0_i32 = arith.constant 0 : i32
    %c0_i32_0 = arith.constant 0 : i32
    return %arg0, %c0_i32, %arg1 : i32, i32, i32
  }
}

</mosaic_0001>

<bundles_post_ra>
// kernel: tpu_custom_call.1
= control target key start
LH: loop header
LB: loop body
LE: loop exit
PB: predicated region body
PF: predicated region fallthrough
CT: control target
= control target key end

     0   :  { %s1278_s0 = inlined_call_operand.hbm [shape: bf16[2,64,128], index: 0, kind: input, shape index: {}]   ;;  %s1279_s1 = inlined_call_operand.hbm [shape: bf16[128,128], index: 1, kind: input, shape index: {}]   ;;  %s1280_s2 = inlined_call_operand.hbm [shape: bf16[2,64,128], index: 2, kind: output, shape index: {}]  }
   0x1   :  { %1290 = sst [smem:[#allocation19_spill]] %s1279_s1 }
   0x2   :  { %1291 = sst [smem:[#allocation20_spill]] %s1280_s2 }
   0x3   :  { %7 = vsyncpa [#allocation5], 0 }
   0x4   :  { %9 = vsyncpa [#allocation5 + $0x1], 0 }
   0x5   :  { %10 = vsyncpa [#allocation8], 0 }
   0x6   :  { %11 = vsyncpa [#allocation6], 0 }
   0x7   :  { %13 = vsyncpa [#allocation6 + $0x1], 0  ;;  %s1055_s9 = smov 0   ;;  %s1057_s10 = smov 0  }
   0x8   :  { %s1059_s11 = smov 0   ;;  %s1061_s12 = smov 0  }
   0x9   :  { %s1063_s13 = smov 0   ;;  %s1065_s14 = smov 0  }
   0xa   :  { %s1067_s15 = smov 0   ;;  %s1069_s16 = smov 0  }
   0xb   :  { %s1071_s17 = smov 0   ;;  %s1073_s18 = smov 0  }
   0xc   :  { %s1075_s19 = smov 0  }
   0xd LB: > { %1292 = sst [smem:[#allocation13_spill]] %s992_s9  ;;  %s584_s20 = sadd.s32 4294967295, %s1032_s19   ;;  %s1032_s19 = sphi %s1075_s19, %s19_s19   ;;  %s1028_s18 = sphi %s1073_s18, %s1323_s18   ;;  %s1024_s17 = sphi %s1071_s17, %s1322_s17   ;;  %s1020_s16 = sphi %s1069_s16, %s1321_s16   ;;  %s1016_s15 = sphi %s1067_s15, %s1320_s15   ;;  %s1012_s14 = sphi %s1065_s14, %s1319_s14   ;;  %s1008_s13 = sphi %s1063_s13, %s1318_s13   ;;  %s1004_s12 = sphi %s1061_s12, %s1317_s12   ;;  %s1000_s11 = sphi %s1059_s11, %s1316_s11   ;;  %s996_s10 = sphi %s1057_s10, %s1315_s10   ;;  %s992_s9 = sphi %s1055_s9, %s1314_s9  }
   0xe   : > { %1293 = sst [smem:[#allocation14_spill]] %s1020_s16  ;;  %s585_s21 = sadd.s32 4294967294, %s1032_s19  }
   0xf   : > { %p60_p0 = scmp.ne.s32.totalorder %s1008_s13, %s1004_s12  ;;  %p1111_p1 = scmp.eq.s32.totalorder %s584_s20, 0 }
  0x10   : > { %p111_p2 = scmp.ne.s32.totalorder %s1000_s11, %s996_s10  ;;  %p112_p3 = scmp.eq.s32.totalorder %s584_s20, 3 }
  0x11   : > { %p1119_p4 = por %p1111_p1, %p60_p0  ;;  %p117_p5 = scmp.ne.s32.totalorder %s996_s10, %s992_s9 }
  0x12   : > { %p1125_p6 = por %p112_p3, %p111_p2  ;;  %p118_p7 = scmp.eq.s32.totalorder %s585_s21, 3 }
  0x13   : > { %p586_p8 = scmp.ge.s32.totalorder %s1032_s19, 1  ;;  %p125_p9 = scmp.lt.s32.totalorder %s1032_s19, 5 }
  0x14   : > { %s1296_s24 = scalar_select %p1125_p6, 1, 0 }
  0x15   : > { %p1131_p10 = por %p118_p7, %p117_p5  ;;  %p1135_p11 = pnand %p586_p8, %p125_p9 }
  0x16   : > { %1297 = sst [smem:[#allocation15_spill]] %s1296_s24  ;;  %s1034_s30 = smov [#allocation7]  }
  0x17   : > { %s1298_s25 = scalar_select %p1131_p10, 1, 0 }
  0x18   : > { %s1301_s1 = sld [smem:[#allocation19_spill]]  ;;  %p734_p12 = pneg %p1135_p11 }
  0x19   : > { %1299 = sst [smem:[#allocation16_spill]] %s1298_s25  ;;  %s140_s3 = sshll.u32 %s1034_s30, 4  ;;  %s141_s3 = int_to_ptr.vmem [resolvable:$true] %s140_s3 }
  0x1a   : > { %p735_p13 = pnand %p734_p12, %p1111_p1  ;;  %s1281_s4 = smov 64  }
  0x1b   : > { %s1282_s5 = smov 4   ;;  %s31_s6 = sadd.s32 1, %s1024_s17 }
  0x1c   : > { %p32_p0 = scmp.ge.s32.totalorder %s31_s6, 2  ;;  %s38_s7 = sadd.s32 1, %s1028_s18 }
  0x1d   : > { %p54_p2 = scmp.ne.s32.totalorder %s1012_s14, %s1008_s13  ;;  %p55_p3 = scmp.eq.s32.totalorder %s1032_s19, 0 }
  0x1e   : > { %s138_s29 = sshll.u32 %s1301_s1, 4  ;;  %s1325_s6 = smov (%p32_p0, %s31_s6), 0  ;;  %s139_s29 = int_to_ptr.hbm [resolvable:$true] %s138_s29 }
  0x1f   : > { %737 = dma.hbm_to_vmem [thread:$0]  (!%p735_p13), %s139_s29, 1024, %s141_s3, [#allocation8], %s1281_s4, %s1281_s4, %s1282_s5  }
  0x20   : > { %1302 = sst [smem:[#allocation17_spill]] %s1325_s6  ;;  %s1327_s7 = smov (!%p32_p0, %s38_s7), %s1028_s18 }
  0x21   : > { %s43_s8 = ssub.s32 %s1024_s17, %s1325_s6  ;;  %s47_s12 = sadd.s32 1, %s1012_s14 }
  0x22   : > { %p40_p5 = scmp.ge.s32.totalorder %s1327_s7, 2  ;;  %p1160_p7 = por %p55_p3, %p54_p2 }
  0x23   : > { %s101_s21 = sadd.s32 1, %s1000_s11  ;;  %s154_s27 = sand.u32 1, %s1012_s14  }
  0x24   : > { %s1329_s7 = smov (%p40_p5, %s1327_s7), 0  ;;  %p747_p8 = scmp.lt.s32.totalorder %s1032_s19, 4 }
  0x25   : > { %1304 = sst [smem:[#allocation18_spill]] %s1329_s7  ;;  %s589_s28 = sshll.u32 %s154_s27, 4 }
  0x26   : > { %s42_s29 = ssub.s32 %s1028_s18, %s1329_s7  ;;  %s590_s3 = sshll.u32 %s1024_s17, 2 }
  0x27   : > { %s44_s30 = sor.u32 %s43_s8, %s42_s29  ;;  %p99_p9 = scmp.eq.s32.totalorder %s42_s29, 0 }
  0x28   : > { %p45_p12 = scmp.eq.s32.totalorder %s44_s30, 0  ;;  %s591_s1 = sshll.u32 %s1028_s18, 3 }
  0x29   : > { %s1173_s4 = scalar_select %p99_p9, %s1000_s11, %s101_s21  }
  0x2a   : > { %s1176_s5 = scalar_select %p45_p12, %s1012_s14, %s47_s12  }
  0x2b   : > { %s158_s6 = scalar_lea.vmem [#allocation4], %s589_s28  ;;  %s163_s9 = sadd.s32 %s591_s1, %s590_s3 }
  0x2c   : > { %s168_s25 = sshll.u32 %s158_s6, 4  ;;  %s592_s2 = sshll.u32 %s163_s9, 2  ;;  %s169_s25 = int_to_ptr.vmem [resolvable:$true] %s168_s25 }
  0x2d   : > { %p739_p13 = pnand %p747_p8, %p1160_p7  ;;  %s165_s7 = scalar_lea.hbm %s1278_s0, %s592_s2 }
  0x2e   : > { %s166_s8 = sshll.u32 %s165_s7, 4  ;;  %s155_s29 = scalar_lea.sflag [#allocation5], %s154_s27  ;;  %s167_s8 = int_to_ptr.hbm [resolvable:$true] %s166_s8 }
  0x2f   : > { %s1305_s21 = smov 4   ;;  %s1306_s30 = smov 64  }
  0x30   : > { %741 = dma.hbm_to_vmem [thread:$0]  (!%p739_p13), %s167_s8, 256, %s169_s25, %s155_s29, %s1306_s30, %s1306_s30, %s1305_s21  }
  0x31   : > { %180 = sbr.rel (%p1135_p11) target bundleno = 326 (0x146), region = 28  ;;  %s182_s1 = sand.u32 (!%p1135_p11), 1, %s1008_s13  }
  0x32   : > { %s1192_s9 = sshll.u32 (!%p1135_p11), %s182_s1, 4  ;;  %s183_s6 = scalar_lea.sflag (!%p1135_p11), [#allocation5], %s182_s1 }
  0x33   : > { %s186_s16 = scalar_lea.vmem (!%p1135_p11), [#allocation4], %s1192_s9 }
  0x36   : > { %979 = dma.done.wait (%p1119_p4), %s183_s6, 256  }
  0x37   : > { %981 = vsyncadd (%p1119_p4), %s183_s6, 4294967040 }
  0x38   : > { %983 = dma.done.wait (%p1111_p1), [#allocation8], 1024  }
  0x39   : > { %985 = vsyncadd (%p1111_p1), [#allocation8], 4294966272  ;;  %s210_s2 = sand.u32 1, %s996_s10   ;;  %p597_p11 = scmp.ne.s32.totalorder %s1016_s15, 0 }
  0x3a   : > { %s596_s24 = sshll.u32 %s210_s2, 5 }
  0x3b   : > { %s1206_s25 = scalar_lea.vmem [#allocation9], %s596_s24  ;;  %217 = sbr.rel (%p597_p11) target bundleno = 67 (0x43), region = 40 }
  0x40   : > { %v1037_v0 = vmov 0.0  }
  0x41   : > { %218 = vst [vmem:[#allocation2] sm:$0x1] %v1037_v0 }
  0x42   : > { %219 = vst [vmem:[#allocation3] sm:$0x1] %v1037_v0 }
  0x43 PF: > { %v663_v1 = vld [vmem:[#allocation7 + $0x38] sm:$0xff]  ;;  %v662_v2 = vld [vmem:[#allocation7 + $0x30] sm:$0xff]  ;;  %v661_v3 = vld [vmem:[#allocation7 + $0x28] sm:$0xff]  ;;  %s638_s22 = sshll.u32 %s1016_s15, 5  ;;  %p640_p1 = scmp.ne.s32.totalorder %s1016_s15, 1 }
  0x44   : > { %300 = vmatpush.bf16.msra.mxu0 %v663_v1  ;;  %718 = vmatpush.bf16.msra.mxu1 %v663_v1  ;;  %v660_v4 = vld [vmem:[#allocation7 + $0x20] sm:$0xff]  ;;  %v659_v5 = vld [vmem:[#allocation7 + $0x18] sm:$0xff]  ;;  %v658_v6 = vld [vmem:[#allocation7 + $0x10] sm:$0xff]  ;;  %s352_s23 = sshra.s32 %s638_s22, 3 }
  0x45   : > { %v657_v7 = vld [vmem:[#allocation7 + $0x8] sm:$0xff]  ;;  %v656_v8 = vld [vmem:[#allocation7] sm:$0xff]  ;;  %s639_s26 = sshll.u32 %s352_s23, 2 }
  0x46   : > { %v654_v9 = vld [vmem:[%s186_s16] sm:$0xff]  ;;  %v655_v10 = vld [vmem:[%s186_s16 + $0x8] sm:$0xff]  ;;  %s355_s7 = scalar_lea.vmem %s1206_s25, %s639_s26 [#allocation9] }
  0x48   : > { %301 = vmatpush.bf16.msra.mxu0 %v662_v2  ;;  %719 = vmatpush.bf16.msra.mxu1 %v662_v2  ;;  %v319_v36 = vld [vmem:[#allocation2] sm:$0x1] }
  0x49   : > { %v331_v39 = vld [vmem:[#allocation3] sm:$0x1] }
  0x4c   : > { %302 = vmatpush.bf16.msra.mxu0 %v661_v3  ;;  %720 = vmatpush.bf16.msra.mxu1 %v661_v3 }
  0x50   : > { %303 = vmatpush.bf16.msra.mxu0 %v660_v4  ;;  %721 = vmatpush.bf16.msra.mxu1 %v660_v4 }
  0x54   : > { %304 = vmatpush.bf16.msra.mxu0 %v659_v5  ;;  %722 = vmatpush.bf16.msra.mxu1 %v659_v5 }
  0x58   : > { %305 = vmatpush.bf16.msra.mxu0 %v658_v6  ;;  %723 = vmatpush.bf16.msra.mxu1 %v658_v6 }
  0x5c   : > { %306 = vmatpush.bf16.msra.mxu0 %v657_v7  ;;  %724 = vmatpush.bf16.msra.mxu1 %v657_v7 }
  0x60   : > { %307 = vmatpush.bf16.msra.mxu0 %v656_v8  ;;  %725 = vmatpush.bf16.msra.mxu1 %v656_v8 }
  0x63   : > { %308 = vmatmul.bf16.vlgmr.msra.gmra.mxu0 %v654_v9  ;;  %313 = vmatmul.bf16.vlgmr.msra.gmra.mxu1 %v655_v10 }
  0xe0   : > { %v309_v11 = vpop.f32.mrf.mxu0  ;;  %v314_v12 = vpop.f32.mrf.mxu1 }
  0xe1   : > { %v332_v15 = vmul.f32 %v309_v11, %v309_v11  ;;  %v334_v20 = vmul.f32 %v314_v12, %v314_v12 }
  0xe8   : > { %v311_v13 = vpop.f32.mrf.mxu0  ;;  %v316_v14 = vpop.f32.mrf.mxu1 }
  0xe9   : > { %v320_v16 = vadd.f32 %v311_v13, %v309_v11  ;;  %v333_v17 = vmul.f32 %v311_v13, %v311_v13  ;;  %v668_v18 = vpack.c.bf16 %v311_v13, %v309_v11  ;;  %v673_v19 = vpack.c.bf16 %v316_v14, %v314_v12 }
  0xea   : > { %v335_v24 = vmul.f32 %v316_v14, %v316_v14 }
  0xeb   : > { %v336_v21 = vadd.f32 %v333_v17, %v332_v15  ;;  %669 = vst [vmem:[%s355_s7] sm:$0xff] %v668_v18   ;;  %v321_v22 = vadd.f32 %v320_v16, %v314_v12 }
  0xec   : > { %711 = vst [vmem:[%s355_s7 + $0x8] sm:$0xff] %v673_v19  }
  0xed   : > { %v322_v23 = vadd.f32 %v321_v22, %v316_v14  ;;  %v337_v25 = vadd.f32 %v336_v21, %v334_v20 }
  0xef   : > { %v323_v26 = vrot.slane %v322_v23, 4  ;;  %v338_v27 = vadd.f32 %v337_v25, %v335_v24 }
  0xf1   : > { %v324_v28 = vadd.f32 %v323_v26, %v322_v23  ;;  %v339_v29 = vrot.slane %v338_v27, 4 }
  0xf3   : > { %v325_v30 = vrot.slane %v324_v28, 2  ;;  %v340_v31 = vadd.f32 %v339_v29, %v338_v27 }
  0xf5   : > { %v326_v32 = vadd.f32 %v325_v30, %v324_v28  ;;  %v341_v33 = vrot.slane %v340_v31, 2 }
  0xf7   : > { %v327_v34 = vrot.slane %v326_v32, 1  ;;  %v342_v35 = vadd.f32 %v341_v33, %v340_v31 }
  0xf9   : > { %v328_v37 = vadd.f32 %v327_v34, %v326_v32  ;;  %v343_v38 = vrot.slane %v342_v35, 1 }
  0xfb   : > { %v329_v40 = vadd.f32 %v328_v37, %v319_v36  ;;  %v344_v41 = vadd.f32 %v343_v38, %v342_v35  ;;  %363 = sbr.rel (%p640_p1) target bundleno = 304 (0x130), region = 44 }
  0xfd   : > { %330 = vst [vmem:[#allocation2] sm:$0x1] %v329_v40  ;;  %v345_v42 = vadd.f32 %v344_v41, %v331_v39 }
  0xff   : > { %346 = vst [vmem:[#allocation3] sm:$0x1] %v345_v42 }
 0x100   : > { %v676_v53 = vld [vmem:[%s1206_s25] sm:$0xff]   ;;  %v712_v55 = vld [vmem:[%s1206_s25 + $0x8] sm:$0xff]   ;;  %v714_v56 = vld [vmem:[%s1206_s25 + $0x10] sm:$0xff]  }
 0x101   : > { %v677_v57 = vunpack.c.l.bf16 %v676_v53  ;;  %v715_v58 = vld [vmem:[%s1206_s25 + $0x18] sm:$0xff]   ;;  %v678_v61 = vunpack.c.h.bf16 %v676_v53  ;;  %v681_v62 = vunpack.c.l.bf16 %v712_v55  ;;  %v682_v63 = vunpack.c.h.bf16 %v712_v55 }
 0x102   : > { %v695_v0 = vunpack.c.l.bf16 %v714_v56  ;;  %v696_v2 = vunpack.c.h.bf16 %v714_v56  ;;  %v699_v3 = vunpack.c.l.bf16 %v715_v58  ;;  %v700_v4 = vunpack.c.h.bf16 %v715_v58 }
 0x104   : > { %v364_v43 = vld [vmem:[#allocation2] sm:$0x1] }
 0x105   : > { %v365_v45 = vmul.f32 0.015625, %v364_v43 }
 0x106   : > { %v366_v44 = vld [vmem:[#allocation3] sm:$0x1] }
 0x107   : > { %v367_v46 = vmul.f32 0.015625, %v366_v44  ;;  %v368_v47 = vmul.f32 %v365_v45, %v365_v45  ;;  %v391_v60 = vperm.slane %v365_v45, 0 }
 0x109   : > { %v369_v48 = vsub.f32 %v367_v46, %v368_v47  ;;  %v393_v6 = vsub.f32 %v677_v57, %v391_v60  ;;  %v394_v7 = vsub.f32 %v678_v61, %v391_v60  ;;  %v395_v8 = vsub.f32 %v681_v62, %v391_v60 }
 0x10a   : > { %v396_v9 = vsub.f32 %v682_v63, %v391_v60  ;;  %v433_v10 = vsub.f32 %v695_v0, %v391_v60  ;;  %v434_v12 = vsub.f32 %v696_v2, %v391_v60  ;;  %v435_v13 = vsub.f32 %v699_v3, %v391_v60 }
 0x10b   : > { %v370_v49 = vmax.f32 %v369_v48, 0.0  ;;  %v436_v14 = vsub.f32 %v700_v4, %v391_v60 }
 0x10d   : > { %v371_v50 = vadd.f32 1e-05, %v370_v49 }
 0x10f   : > { %844 = vrsqrt.f32 %v371_v50  ;;  %vm378_vm0 = vweird.f32 %v371_v50 }
 0x115   : > { %v845_v51 = vpop.eup %844 }
 0x116   : > { %v373_v52 = vmul.f32 %v845_v51, %v371_v50  ;;  %vm379_vm1 = vweird.f32 %v845_v51 }
 0x117   : > { %vm380_vm2 = vmor %vm378_vm0, %vm379_vm1 }
 0x118   : > { %v374_v54 = vmul.f32 %v845_v51, %v373_v52 }
 0x11a   : > { %v375_v59 = vmul.f32 0.5, %v374_v54 }
 0x11c   : > { %v376_v1 = vsub.f32 1.5, %v375_v59 }
 0x11e   : > { %v377_v5 = vmul.f32 %v845_v51, %v376_v1 }
 0x120   : > { %v381_v11 = vsel %vm380_vm2, %v845_v51, %v377_v5 }
 0x121   : > { %v398_v15 = vperm.slane %v381_v11, 0 }
 0x123   : > { %v400_v16 = vmul.f32 %v398_v15, %v393_v6  ;;  %v401_v17 = vmul.f32 %v398_v15, %v394_v7  ;;  %v402_v18 = vmul.f32 %v398_v15, %v395_v8  ;;  %v403_v19 = vmul.f32 %v398_v15, %v396_v9 }
 0x124   : > { %v437_v20 = vmul.f32 %v433_v10, %v398_v15  ;;  %v438_v21 = vmul.f32 %v434_v12, %v398_v15  ;;  %v439_v22 = vmul.f32 %v435_v13, %v398_v15  ;;  %v440_v23 = vmul.f32 %v436_v14, %v398_v15 }
 0x125   : > { %vm404_vm3 = vcmp.gt.f32.partialorder %v400_v16, 0.0  ;;  %vm405_vm4 = vcmp.gt.f32.partialorder %v401_v17, 0.0  ;;  %v408_v24 = vmul.f32 0.2, %v400_v16  ;;  %v409_v25 = vmul.f32 0.2, %v401_v17 }
 0x126   : > { %vm406_vm5 = vcmp.gt.f32.partialorder %v402_v18, 0.0  ;;  %vm407_vm6 = vcmp.gt.f32.partialorder %v403_v19, 0.0  ;;  %v410_v26 = vmul.f32 0.2, %v402_v18  ;;  %v411_v27 = vmul.f32 0.2, %v403_v19 }
 0x127   : > { %v412_v28 = vsel %vm404_vm3, %v400_v16, %v408_v24  ;;  %v413_v29 = vsel %vm405_vm4, %v401_v17, %v409_v25  ;;  %vm441_vm7 = vcmp.gt.f32.partialorder %v437_v20, 0.0  ;;  %vm442_vm8 = vcmp.gt.f32.partialorder %v438_v21, 0.0 }
 0x128   : > { %v686_v30 = vpack.c.bf16 %v413_v29, %v412_v28  ;;  %v414_v31 = vsel %vm406_vm5, %v402_v18, %v410_v26  ;;  %v415_v32 = vsel %vm407_vm6, %v403_v19, %v411_v27  ;;  %v445_v33 = vmul.f32 0.2, %v437_v20 }
 0x129   : > { %v691_v34 = vpack.c.bf16 %v415_v32, %v414_v31  ;;  %v446_v35 = vmul.f32 0.2, %v438_v21  ;;  %vm443_vm9 = vcmp.gt.f32.partialorder %v439_v22, 0.0  ;;  %vm444_vm10 = vcmp.gt.f32.partialorder %v440_v23, 0.0 }
 0x12a   : > { %687 = vst [vmem:[%s1206_s25] sm:$0xff] %v686_v30   ;;  %v449_v36 = vsel %vm441_vm7, %v437_v20, %v445_v33  ;;  %v447_v37 = vmul.f32 0.2, %v439_v22  ;;  %v448_v38 = vmul.f32 0.2, %v440_v23 }
 0x12b   : > { %713 = vst [vmem:[%s1206_s25 + $0x8] sm:$0xff] %v691_v34   ;;  %v450_v39 = vsel %vm442_vm8, %v438_v21, %v446_v35 }
 0x12c   : > { %v704_v40 = vpack.c.bf16 %v450_v39, %v449_v36  ;;  %v451_v41 = vsel %vm443_vm9, %v439_v22, %v447_v37  ;;  %v452_v42 = vsel %vm444_vm10, %v440_v23, %v448_v38 }
 0x12d   : > { %v709_v43 = vpack.c.bf16 %v452_v42, %v451_v41 }
 0x12e   : > { %716 = vst [vmem:[%s1206_s25 + $0x10] sm:$0xff] %v704_v40  }
 0x12f   : > { %717 = vst [vmem:[%s1206_s25 + $0x18] sm:$0xff] %v709_v43  }
 0x130 PF: > { %s1307_s15 = sld [smem:[#allocation14_spill]]  ;;  %s475_s29 = sshll.u32 %s1206_s25, 4  ;;  %s476_s29 = int_to_ptr.vmem [resolvable:$true] %s475_s29 }
 0x131   : > { %s1309_s3 = sld [smem:[#allocation20_spill]]  ;;  %s462_s30 = scalar_lea.sflag [#allocation6], %s210_s2 }
 0x136   : > { %s664_s20 = sshll.u32 %s1307_s15, 5 }
 0x137   : > { %s474_s8 = scalar_lea.hbm %s1309_s3, %s664_s20  ;;  %s926_s24 = scalar_lea.hbm %s1309_s3, 64 }
 0x138   : > { %s477_s21 = sshll.u32 %s474_s8, 4  ;;  %s478_s21 = int_to_ptr.hbm [resolvable:$true] %s477_s21 }
 0x139   : > { %s920_s1 = sshra.s32 %s478_s21, 4  ;;  %s921_s1 = int_to_ptr.hbm [resolvable:$true] %s920_s1 }
 0x13a   : > { %s922_s9 = scalar_lea.hbm %s921_s1, 32  ;;  %p927_p3 = scmp.lt.s32.totalorder %s921_s1, %s1309_s3 }
 0x13b   : > { %p923_p4 = scmp.ne.s32.totalorder %s921_s1, %s922_s9  ;;  %p928_p5 = scmp.lt.s32.totalorder %s926_s24, %s922_s9 }
 0x13d   : > { %p924_p0 = pnand %p923_p4, %p1125_p6  ;;  %p929_p7 = por %p928_p5, %p927_p3 }
 0x13f   : > { %p925_p2 = pneg %p924_p0 }
 0x141   : > { %p930_p8 = pnand %p929_p7, %p925_p2 }
 0x143   : > { %933 = shalt.err (!%p930_p8)
}
 0x144   : > { %s1038_s2 = smov 64   ;;  %s1039_s25 = smov 4  }
 0x145   : > { %732 = dma.vmem_to_hbm [thread:$0]  (%p1125_p6), %s476_s29, 512, %s478_s21, %s462_s30, %s1038_s2, %s1038_s2, %s1039_s25  }
 0x146 PF: > { %s1310_s26 = sld [smem:[#allocation13_spill]]  ;;  %p749_p9 = scmp.ge.s32.totalorder %s1032_s19, 2 }
 0x148   : > { %p743_p12 = pnand %p749_p9, %p1131_p10 }
 0x14a   : > { %p744_p13 = pneg %p743_p12 }
 0x14c   : > { %s492_s15 = sand.u32 1, %s1310_s26  }
 0x14d   : > { %s493_s20 = scalar_lea.sflag [#allocation6], %s492_s15 }
 0x14e   : > { %987 = dma.done.wait (%p744_p13), %s493_s20, 512  }
 0x14f   : > { %989 = vsyncadd (%p744_p13), %s493_s20, 4294966784  ;;  %s19_s19 = sadd.s32 1, %s1032_s19   ;;  %s1312_s27 = sld [smem:[#allocation17_spill]] }
 0x150   : > { %p16_p11 = scmp.ge.s32.totalorder %s19_s19, 6   ;;  %s1313_s28 = sld [smem:[#allocation18_spill]] }
 0x151   : > { %s1314_s9 = smov %s996_s10  ;;  %s1315_s10 = smov %s1000_s11 }
 0x152   : > { %s1316_s11 = smov %s1173_s4  ;;  %s1317_s12 = smov %s1008_s13 }
 0x153   : > { %s1318_s13 = smov %s1012_s14  ;;  %s1319_s14 = smov %s1176_s5 }
 0x154   : > { %s1320_s15 = smov %s1024_s17  ;;  %s1321_s16 = smov %s1028_s18 }
 0x155   : > { %s1322_s17 = smov %s1312_s27  ;;  %18 = sbr.rel (!%p16_p11) target bundleno = 13 (0xd), region = 88 }
 0x156   : > { %s1323_s18 = smov %s1313_s28 }
 0x15a   :  { %499 = vsyncpa [#allocation5], 1 }
 0x15b   :  { %501 = vsyncpa [#allocation5 + $0x1], 1 }
 0x15c   :  { %502 = vsyncpa [#allocation8], 1 }
 0x15d   :  { %503 = vsyncpa [#allocation6], 1 }
 0x15e   :  { %505 = vsyncpa [#allocation6 + $0x1], 1 }

</bundles_post_ra>
